<compile_context>
chip_gen: v7x
topology: tpu7x:2x2x1
jax: 0.10.0
libtpu: 0.0.40
codegen_flags: <defaults>
</compile_context>

<pallas_src>
import functools

import jax
import jax.numpy as jnp
from jax.experimental import pallas as pl
from jax.experimental.pallas import tpu as pltpu

LANES = 128
# 8192 rows * 128 lanes * 4 B = 4 MiB per f32 input buffer.
# 2 inputs * 2 pipeline buffers * 4 MiB = 16 MiB of input VMEM.
MAX_BLOCK_ROWS = 8192
# Aim for >= 4 grid blocks so v7x's 2 TensorCores both get work.
MIN_BLOCKS = 4
# Explicit scoped-VMEM limit: covers the 16 MiB of double-buffered inputs with
# headroom on every generation (v5e default is only 16 MiB).
VMEM_LIMIT_BYTES = 40 * 1024 * 1024


def _round_up(x, m):
    return ((x + m - 1) // m) * m


def _huber_sum(preds_f32, target_f32, delta):
    """Branchless Huber loss (sum, not mean) on f32 arrays."""
    e = target_f32 - preds_f32
    abs_e = jnp.abs(e)
    clipped = jnp.minimum(abs_e, delta)
    # |e| <  delta : 0.5*e^2
    # |e| >= delta : 0.5*delta^2 + delta*(|e|-delta) = delta*(|e| - 0.5*delta)
    return jnp.sum(0.5 * clipped * clipped + delta * (abs_e - clipped))


def _huber_block_kernel(preds_ref, target_ref, out_ref, *, delta, rows_valid,
                        block_rows, needs_mask, out_sub):
    def compute_loss():
        e = target_ref[...].astype(jnp.float32) - preds_ref[...].astype(jnp.float32)
        abs_e = jnp.abs(e)
        clipped = jnp.minimum(abs_e, delta)
        return 0.5 * clipped * clipped + delta * (abs_e - clipped)

    def store(loss):
        if out_sub == 8:
            # Lane-dense (8, 128) partial: full-vreg unmasked store, no
            # in-kernel cross-sublane reduce.
            part = loss.reshape(block_rows // 8, 8, LANES).sum(axis=0)
            out_ref[...] = part.reshape(1, 8, LANES)
        else:
            out_ref[...] = jnp.sum(loss, axis=0).reshape(1, 1, LANES)

    if not needs_mask:
        store(compute_loss())
    else:
        i = pl.program_id(0)
        last = pl.num_programs(0) - 1

        @pl.when(i < last)
        def _():
            # Full blocks: no masking work at all.
            store(compute_loss())

        @pl.when(i == last)
        def _():
            # Tail block only: zero out rows past the valid range.
            loss = compute_loss()
            row = jax.lax.broadcasted_iota(jnp.int32, loss.shape, 0)
            grow = i * block_rows + row
            store(jnp.where(grow < rows_valid, loss, 0.0))


def huber_loss(preds, target, delta):
    """Pallas-backed Huber loss with mean reduction (matches the PyTorch module)."""
    assert preds.shape == target.shape, "preds/target must have the same shape"
    delta = float(delta)
    n_true = preds.size

    p_flat = preds.reshape(-1)
    t_flat = target.reshape(-1)

    rows = n_true // LANES
    n_aligned = rows * LANES
    rem = n_true - n_aligned

    # Ragged tail (< 128 elements): reduce with plain jnp, no full-array pad.
    if rem:
        tail_sum = _huber_sum(p_flat[n_aligned:].astype(jnp.float32),
                              t_flat[n_aligned:].astype(jnp.float32),
                              delta)
    else:
        tail_sum = jnp.float32(0.0)

    if rows == 0:
        # Entire input is smaller than one lane row.
        return tail_sum / jnp.float32(n_true)

    p2 = p_flat[:n_aligned].reshape(rows, LANES)
    t2 = t_flat[:n_aligned].reshape(rows, LANES)

    # Block-row selection:
    #   * tiny inputs (rows <= 8): single full-extent block,
    #   * otherwise: multiple-of-8 rows, targeting >= MIN_BLOCKS blocks,
    #     capped at MAX_BLOCK_ROWS.
    if rows <= 8:
        block_rows = rows
    else:
        block_rows = min(MAX_BLOCK_ROWS, _round_up(pl.cdiv(rows, MIN_BLOCKS), 8))
        block_rows = max(block_rows, 8)

    num_blocks = pl.cdiv(rows, block_rows)
    needs_mask = (num_blocks * block_rows) > rows
    out_sub = 8 if (block_rows % 8 == 0) else 1

    kernel = functools.partial(
        _huber_block_kernel,
        delta=delta,
        rows_valid=rows,
        block_rows=block_rows,
        needs_mask=needs_mask,
        out_sub=out_sub,
    )

    partials = pl.pallas_call(
        kernel,
        out_shape=jax.ShapeDtypeStruct((num_blocks, out_sub, LANES), jnp.float32),
        grid_spec=pltpu.PrefetchScalarGridSpec(
            num_scalar_prefetch=0,
            grid=(num_blocks,),
            in_specs=[
                pl.BlockSpec((block_rows, LANES), lambda i: (i, 0)),
                pl.BlockSpec((block_rows, LANES), lambda i: (i, 0)),
            ],
            out_specs=pl.BlockSpec((1, out_sub, LANES), lambda i: (i, 0, 0)),
        ),
        compiler_params=pltpu.CompilerParams(
            # Every block is independent -> shardable across TensorCores.
            dimension_semantics=("parallel",),
            vmem_limit_bytes=VMEM_LIMIT_BYTES,
        ),
    )(p2, t2)

    # Tiny final reduction (num_blocks x out_sub x 128 f32) done by XLA.
    return (jnp.sum(partials) + tail_sum) / jnp.float32(n_true)


def huber_loss_ref(preds, target, delta):
    e = target.astype(jnp.float32) - preds.astype(jnp.float32)
    abs_e = jnp.abs(e)
    small = 0.5 * e * e
    large = delta * (abs_e - 0.5 * delta)
    return jnp.mean(jnp.where(abs_e < delta, small, large))


if __name__ == "__main__":
    key = jax.random.PRNGKey(0)
    delta = 1.0
    ks = jax.random.split(key, 10)

    # Primary case: small NCHW regression preds/targets (numel % 128 == 0),
    # rows=16 -> 2 blocks of 8 rows (exercises the multi-block parallel grid).
    preds = jax.random.normal(ks[0], (2, 4, 16, 16), dtype=jnp.float32)
    target = jax.random.normal(ks[1], (2, 4, 16, 16), dtype=jnp.float32)
    out = jax.block_until_ready(huber_loss(preds, target, delta))
    ref = huber_loss_ref(preds, target, delta)
    assert jnp.allclose(out, ref, rtol=1e-5, atol=1e-6), (out, ref)

    # Unaligned size (exercises the ragged-tail wrapper path AND a masked
    # tail block: 1155 elems -> rows=9, block_rows=8, 2 blocks).
    p_u = jax.random.normal(ks[2], (3, 5, 7, 11), dtype=jnp.float32)
    t_u = jax.random.normal(ks[3], (3, 5, 7, 11), dtype=jnp.float32)
    out_u = jax.block_until_ready(huber_loss(p_u, t_u, delta))
    ref_u = huber_loss_ref(p_u, t_u, delta)
    assert jnp.allclose(out_u, ref_u, rtol=1e-5, atol=1e-6), (out_u, ref_u)

    # Multi-block case with a partial tail block (rows=100, block_rows=32,
    # 4 blocks, last block masked via pl.when).
    p_m = jax.random.normal(ks[4], (2, 50, 128), dtype=jnp.float32)
    t_m = jax.random.normal(ks[5], (2, 50, 128), dtype=jnp.float32)
    out_m = jax.block_until_ready(huber_loss(p_m, t_m, delta))
    ref_m = huber_loss_ref(p_m, t_m, delta)
    assert jnp.allclose(out_m, ref_m, rtol=1e-5, atol=1e-6), (out_m, ref_m)

    # Tiny input (rows=4 < 8): single full-extent block, 1-sublane partial.
    p_s = jax.random.normal(ks[6], (4, 128), dtype=jnp.float32)
    t_s = jax.random.normal(ks[7], (4, 128), dtype=jnp.float32)
    out_s = jax.block_until_ready(huber_loss(p_s, t_s, delta))
    ref_s = huber_loss_ref(p_s, t_s, delta)
    assert jnp.allclose(out_s, ref_s, rtol=1e-5, atol=1e-6), (out_s, ref_s)

    # bf16 inputs streamed in native dtype, cast to f32 on-chip.
    p_b = jax.random.normal(ks[8], (2, 4, 16, 16), dtype=jnp.bfloat16)
    t_b = jax.random.normal(ks[9], (2, 4, 16, 16), dtype=jnp.bfloat16)
    out_b = jax.block_until_ready(huber_loss(p_b, t_b, delta))
    ref_b = huber_loss_ref(p_b, t_b, delta)
    assert jnp.allclose(out_b, ref_b, rtol=1e-3, atol=1e-4), (out_b, ref_b)

    print("KERNEL_OK")
</pallas_src>

<mosaic_0001>
module attributes {stable_mosaic.version = 11 : i64} {
  func.func @_huber_block_kernel(%arg0: i32, %arg1: memref<8x128xf32, #tpu.memory_space<vmem>>, %arg2: memref<8x128xf32, #tpu.memory_space<vmem>>, %arg3: memref<1x8x128xf32, #tpu.memory_space<vmem>>) attributes {dimension_semantics = [#tpu.dimension_semantics<parallel>], iteration_bounds = array<i64: 2>, scalar_prefetch = 0 : i64, scratch_operands = 0 : i64, tpu.core_type = #tpu.core_type<tc>, window_params = [{transform_indices = @transform_0, window_bounds = array<i64: 8, 128>}, {transform_indices = @transform_1, window_bounds = array<i64: 8, 128>}, {transform_indices = @transform_2, window_bounds = array<i64: 1, 8, 128>}]} {
    %c0 = arith.constant 0 : index
    %c0_0 = arith.constant 0 : index
    %0 = vector.load %arg2[%c0, %c0_0] : memref<8x128xf32, #tpu.memory_space<vmem>>, vector<8x128xf32>
    %c0_1 = arith.constant 0 : index
    %c0_2 = arith.constant 0 : index
    %1 = vector.load %arg1[%c0_1, %c0_2] : memref<8x128xf32, #tpu.memory_space<vmem>>, vector<8x128xf32>
    %2 = arith.subf %0, %1 : vector<8x128xf32>
    %3 = math.absf %2 : vector<8x128xf32>
    %cst = arith.constant 1.000000e+00 : f32
    %4 = vector.broadcast %cst : f32 to vector<8x128xf32>
    %5 = arith.minimumf %3, %4 : vector<8x128xf32>
    %cst_3 = arith.constant 5.000000e-01 : f32
    %6 = vector.broadcast %cst_3 : f32 to vector<8x128xf32>
    %7 = arith.mulf %6, %5 : vector<8x128xf32>
    %8 = arith.mulf %7, %5 : vector<8x128xf32>
    %9 = arith.subf %3, %5 : vector<8x128xf32>
    %cst_4 = arith.constant 1.000000e+00 : f32
    %10 = vector.broadcast %cst_4 : f32 to vector<8x128xf32>
    %11 = arith.mulf %10, %9 : vector<8x128xf32>
    %12 = arith.addf %8, %11 : vector<8x128xf32>
    %13 = vector.shape_cast %12 : vector<8x128xf32> to vector<1x8x128xf32>
    %cst_5 = arith.constant dense<0.000000e+00> : vector<8x128xf32>
    %14 = vector.multi_reduction <add>, %13, %cst_5 [0] : vector<1x8x128xf32> to vector<8x128xf32>
    %15 = vector.shape_cast %14 : vector<8x128xf32> to vector<1x8x128xf32>
    %c0_6 = arith.constant 0 : index
    %c0_7 = arith.constant 0 : index
    %c0_8 = arith.constant 0 : index
    %16 = vector.load %arg3[%c0_6, %c0_7, %c0_8] : memref<1x8x128xf32, #tpu.memory_space<vmem>>, vector<1x8x128xf32>
    tpu.vector_store %arg3[%c0_6, %c0_7, %c0_8], %15 {strides = array<i32>} : memref<1x8x128xf32, #tpu.memory_space<vmem>>, vector<1x8x128xf32>,
    return
  }
  func.func @transform_0(%arg0: i32) -> (i32, i32) {
    %c0_i32 = arith.constant 0 : i32
    %c0_i32_0 = arith.constant 0 : i32
    return %arg0, %c0_i32 : i32, i32
  }
  func.func @transform_1(%arg0: i32) -> (i32, i32) {
    %c0_i32 = arith.constant 0 : i32
    %c0_i32_0 = arith.constant 0 : i32
    return %arg0, %c0_i32 : i32, i32
  }
  func.func @transform_2(%arg0: i32) -> (i32, i32, i32) {
    %c0_i32 = arith.constant 0 : i32
    %c0_i32_0 = arith.constant 0 : i32
    %c0_i32_1 = arith.constant 0 : i32
    return %arg0, %c0_i32, %c0_i32_0 : i32, i32, i32
  }
}

</mosaic_0001>

<bundles_post_ra>
// kernel: tpu_custom_call.1
= control target key start
LH: loop header
LB: loop body
LE: loop exit
PB: predicated region body
PF: predicated region fallthrough
CT: control target
= control target key end

     0   :  { %7 = vsyncpa [#allocation3], 0  ;;  %s739_s0 = inlined_call_operand.hbm [shape: f32[16,128], index: 0, kind: input, shape index: {}]   ;;  %s740_s1 = inlined_call_operand.hbm [shape: f32[16,128], index: 1, kind: input, shape index: {}]   ;;  %s741_s2 = inlined_call_operand.hbm [shape: f32[2,8,128], index: 2, kind: output, shape index: {}]  }
   0x1   :  { %9 = vsyncpa [#allocation3 + $0x1], 0 }
   0x2   :  { %10 = vsyncpa [#allocation6], 0 }
   0x3   :  { %12 = vsyncpa [#allocation6 + $0x1], 0 }
   0x4   :  { %13 = vsyncpa [#allocation4], 0 }
   0x5   :  { %15 = vsyncpa [#allocation4 + $0x1], 0  ;;  %s530_s9 = smov 0   ;;  %s532_s10 = smov 0  }
   0x6   :  { %s534_s11 = smov 0   ;;  %s536_s12 = smov 0  }
   0x7 LB: > { %s551_s13 = sadd.s32 4294967295, %s510_s12   ;;  %s314_s14 = sadd.s32 4294967294, %s510_s12   ;;  %s510_s12 = sphi %s536_s12, %s760_s12   ;;  %s506_s11 = sphi %s534_s11, %s759_s11   ;;  %s502_s10 = sphi %s532_s10, %s758_s10   ;;  %s498_s9 = sphi %s530_s9, %s757_s9  }
   0x8   : > { %s555_s15 = sadd.s32 1, %s510_s12   ;;  %s28_s16 = sadd.s32 1, %s506_s11 }
   0x9   : > { %s25_s17 = ssub.s32 %s510_s12, %s555_s15  ;;  %p35_p0 = scmp.ne.s32.totalorder %s506_s11, %s502_s10 }
   0xa   : > { %p26_p1 = scmp.eq.s32.totalorder %s25_s17, 0  ;;  %p36_p2 = scmp.eq.s32.totalorder %s510_s12, 0 }
   0xb   : > { %p41_p3 = scmp.ne.s32.totalorder %s502_s10, %s498_s9  ;;  %p42_p4 = scmp.eq.s32.totalorder %s551_s13, 0 }
   0xc   : > { %s567_s18 = scalar_select %p26_p1, %s506_s11, %s28_s16  }
   0xd   : > { %p569_p5 = por %p36_p2, %p35_p0  ;;  %p573_p6 = por %p42_p4, %p41_p3 }
   0xe   : > { %p91_p7 = scmp.eq.s32.totalorder %s551_s13, 1  ;;  %p97_p8 = scmp.eq.s32.totalorder %s314_s14, 1 }
   0xf   : > { %s745_s20 = scalar_select %p573_p6, 1, 0 }
  0x10   : > { %p346_p10 = scmp.lt.s32.totalorder %s510_s12, 2  ;;  %p580_p11 = por %p91_p7, %p35_p0 }
  0x11   : > { %p584_p12 = por %p97_p8, %p41_p3  ;;  %s589_s23 = sand.u32 1, %s506_s11  }
  0x12   : > { %s746_s21 = scalar_select %p580_p11, 1, 0 }
  0x13   : > { %s747_s22 = scalar_select %p584_p12, 1, 0 }
  0x14   : > { %s318_s24 = sshll.u32 %s510_s12, 7  ;;  %s317_s25 = sshll.u32 %s589_s23, 3 }
  0x15   : > { %s598_s28 = scalar_lea.hbm %s739_s0, %s318_s24  ;;  %s121_s29 = scalar_lea.vmem [#allocation2], %s317_s25 }
  0x16   : > { %s128_s30 = sshll.u32 %s121_s29, 4  ;;  %p604_p13 = pnand %p346_p10, %p569_p5  ;;  %s608_s30 = int_to_ptr.vmem [resolvable:$true] %s128_s30 }
  0x17   : > { %s118_s4 = scalar_lea.sflag [#allocation3], %s589_s23  ;;  %s380_s5 = scalar_lea.hbm %s598_s28, 128 }
  0x18   : > { %p381_p2 = scmp.ne.s32.totalorder %s598_s28, %s380_s5  ;;  %p382_p3 = pneg %p604_p13 }
  0x19   : > { %s385_s8 = scalar_lea.hbm %s739_s0, 256  ;;  %p386_p5 = scmp.lt.u32.totalorder %s598_s28, %s739_s0 }
  0x1a   : > { %p383_p4 = pnand %p382_p3, %p381_p2  ;;  %p387_p8 = scmp.lt.u32.totalorder %s385_s8, %s380_s5 }
  0x1b   : > { %p389_p9 = scmp.lt.u32.totalorder %s380_s5, %s598_s28 }
  0x1c   : > { %p384_p7 = pneg %p383_p4  ;;  %p388_p10 = por %p387_p8, %p386_p5 }
  0x1e   : > { %p390_p0 = por %p389_p9, %p388_p10 }
  0x20   : > { %p391_p1 = pnand %p390_p0, %p384_p7 }
  0x22   : > { %394 = shalt.err (!%p391_p1)
}
  0x23   : > { %s395_s17 = scalar_lea.vmem %s608_s30, 128  ;;  %s512_s19 = smov [#allocation2]  }
  0x24   : > { %p396_p2 = scmp.ne.s32.totalorder %s608_s30, %s395_s17  ;;  %s400_s26 = sshll.u32 %s512_s19, 4  ;;  %s401_s26 = int_to_ptr.vmem [resolvable:$false] %s400_s26 }
  0x25   : > { %s402_s27 = scalar_lea.vmem %s401_s26, 256  ;;  %p403_p11 = scmp.lt.s32.totalorder %s608_s30, %s401_s26 }
  0x26   : > { %p398_p4 = pnand %p396_p2, %p382_p3  ;;  %p404_p5 = scmp.lt.s32.totalorder %s402_s27, %s395_s17 }
  0x28   : > { %p399_p12 = pneg %p398_p4  ;;  %p405_p8 = por %p404_p5, %p403_p11 }
  0x2a   : > { %p406_p9 = pnand %p405_p8, %p399_p12 }
  0x2c   : > { %409 = shalt.err (!%p406_p9)
}
  0x2d   : > { %338 = dma.hbm_to_vmem [thread:$0]  (!%p604_p13), %s598_s28, 128, %s608_s30, %s118_s4  }
  0x2e   : > { %p749_p0 = scmp.lt.s32.totalorder %s510_s12, 3  ;;  %p750_p1 = scmp.ge.s32.totalorder %s510_s12, 1 }
  0x2f   : > { %s651_s7 = scalar_lea.hbm %s740_s1, %s318_s24  ;;  %s139_s8 = scalar_lea.vmem [#allocation5], %s317_s25 }
  0x30   : > { %p642_p7 = pnand %p750_p1, %p749_p0  ;;  %s146_s14 = sshll.u32 %s139_s8, 4  ;;  %s147_s14 = int_to_ptr.vmem [resolvable:$true] %s146_s14 }
  0x31   : > { %s136_s28 = scalar_lea.sflag [#allocation6], %s589_s23  ;;  %s410_s30 = scalar_lea.hbm %s651_s7, 128 }
  0x32   : > { %s751_s29 = scalar_select %p642_p7, 1, 0 }
  0x33   : > { %p411_p11 = scmp.ne.s32.totalorder %s651_s7, %s410_s30  ;;  %s415_s24 = scalar_lea.hbm %s740_s1, 256 }
  0x34   : > { %p416_p2 = scmp.lt.u32.totalorder %s651_s7, %s740_s1  ;;  %p417_p4 = scmp.lt.u32.totalorder %s415_s24, %s410_s30 }
  0x35   : > { %p413_p12 = pnand %p411_p11, %p382_p3  ;;  %p419_p8 = scmp.lt.u32.totalorder %s410_s30, %s651_s7 }
  0x36   : > { %p418_p5 = por %p417_p4, %p416_p2 }
  0x37   : > { %p414_p10 = pneg %p413_p12 }
  0x38   : > { %p420_p9 = por %p419_p8, %p418_p5 }
  0x3a   : > { %p421_p0 = pnand %p420_p9, %p414_p10 }
  0x3c   : > { %424 = shalt.err (!%p421_p0)
}
  0x3d   : > { %s425_s23 = scalar_lea.vmem %s147_s14, 128  ;;  %s513_s25 = smov [#allocation5]  }
  0x3e   : > { %p426_p1 = scmp.ne.s32.totalorder %s147_s14, %s425_s23  ;;  %s430_s26 = sshll.u32 %s513_s25, 4  ;;  %s431_s26 = int_to_ptr.vmem [resolvable:$false] %s430_s26 }
  0x3f   : > { %s432_s27 = scalar_lea.vmem %s431_s26, 256  ;;  %p433_p6 = scmp.lt.s32.totalorder %s147_s14, %s431_s26 }
  0x40   : > { %p428_p11 = pnand %p426_p1, %p382_p3  ;;  %p434_p7 = scmp.lt.s32.totalorder %s432_s27, %s425_s23 }
  0x42   : > { %p429_p12 = pneg %p428_p11  ;;  %p435_p2 = por %p434_p7, %p433_p6 }
  0x44   : > { %p436_p4 = pnand %p435_p2, %p429_p12 }
  0x46   : > { %439 = shalt.err (!%p436_p4)
}
  0x47   : > { %341 = dma.hbm_to_vmem [thread:$0]  (!%p604_p13), %s651_s7, 128, %s147_s14, %s136_s28  }
  0x48   : > { %p752_p10 = scmp.ne.s32.totalorder %s751_s29, 0 }
  0x49   : > { %s678_s5 = sand.u32 (!%p752_p10), 1, %s502_s10   ;;  %p753_p3 = scmp.ne.s32.totalorder (!%p752_p10), %s745_s20, 0 }
  0x4a   : > { %155 = sbr.rel (%p752_p10) target bundleno = 111 (0x6f), region = 28  ;;  %s322_s6 = sshll.u32 (!%p752_p10), %s678_s5, 3 }
  0x4b   : > { %s158_s8 = scalar_lea.sflag (!%p752_p10), [#allocation3], %s678_s5  ;;  %s161_s30 = scalar_lea.vmem (!%p752_p10), [#allocation2], %s322_s6 }
  0x51   : > { %485 = dma.done.wait (%p753_p3), %s158_s8, 128  }
  0x52   : > { %487 = vsyncadd (%p753_p3), %s158_s8, 4294967168  ;;  %s167_s3 = scalar_lea.sflag [#allocation6], %s678_s5  ;;  %s170_s7 = scalar_lea.vmem [#allocation5], %s322_s6 }
  0x53   : > { %489 = dma.done.wait (%p753_p3), %s167_s3, 128  }
  0x54   : > { %491 = vsyncadd (%p753_p3), %s167_s3, 4294967168  ;;  %v196_v0 = vld [vmem:[%s170_s7] sm:$0xff]  ;;  %v197_v1 = vld [vmem:[%s161_s30] sm:$0xff]  ;;  %s195_s29 = scalar_lea.vmem [#allocation7], %s322_s6  ;;  %s326_s28 = sshll.u32 %s551_s13, 7 }
  0x55   : > { %v198_v2 = vsub.f32 %v196_v0, %v197_v1  ;;  %s221_s14 = sshll.u32 %s195_s29, 4  ;;  %s697_s16 = scalar_lea.hbm %s741_s2, %s326_s28  ;;  %s692_s14 = int_to_ptr.vmem [resolvable:$true] %s221_s14 }
  0x56   : > { %s208_s24 = scalar_lea.sflag [#allocation4], %s678_s5  ;;  %s440_s17 = scalar_lea.vmem %s692_s14, 128 }
  0x57   : > { %v199_v3 = vand.u32 2147483647, %v198_v2  ;;  %p441_p6 = scmp.ne.s32.totalorder %s692_s14, %s440_s17  ;;  %p754_p13 = scmp.ne.s32.totalorder %s746_s21, 0 }
  0x58   : > { %s514_s13 = smov [#allocation7]  }
  0x59   : > { %v200_v4 = vmin.f32 %v199_v3, 1.0  ;;  %p442_p7 = pnand %p441_p6, %p754_p13  ;;  %s444_s19 = sshll.u32 %s514_s13, 4  ;;  %s445_s19 = int_to_ptr.vmem [resolvable:$false] %s444_s19 }
  0x5a   : > { %s446_s23 = scalar_lea.vmem %s445_s19, 256  ;;  %p447_p8 = scmp.lt.s32.totalorder %s692_s14, %s445_s19 }
  0x5b   : > { %v201_v5 = vmul.f32 0.5, %v200_v4  ;;  %v203_v6 = vsub.f32 %v199_v3, %v200_v4  ;;  %p443_p5 = pneg %p442_p7  ;;  %p448_p9 = scmp.lt.s32.totalorder %s446_s23, %s440_s17 }
  0x5d   : > { %v202_v7 = vmul.f32 %v201_v5, %v200_v4  ;;  %p449_p0 = por %p448_p9, %p447_p8 }
  0x5f   : > { %v204_v8 = vadd.f32 %v203_v6, %v202_v7  ;;  %p450_p1 = pnand %p449_p0, %p443_p5 }
  0x61   : > { %206 = vst [vmem:[%s195_s29] sm:$0xff] %v204_v8 }
  0x62   : > { %453 = shalt.err (!%p450_p1)
}
  0x63   : > { %s454_s25 = scalar_lea.hbm %s697_s16, 128  ;;  %s458_s5 = scalar_lea.hbm %s741_s2, 256 }
  0x64   : > { %p455_p11 = scmp.ne.s32.totalorder %s697_s16, %s454_s25  ;;  %p459_p4 = scmp.lt.u32.totalorder %s697_s16, %s741_s2 }
  0x65   : > { %p460_p10 = scmp.lt.u32.totalorder %s458_s5, %s454_s25  ;;  %p462_p6 = scmp.lt.u32.totalorder %s454_s25, %s697_s16 }
  0x66   : > { %p456_p12 = pnand %p455_p11, %p754_p13 }
  0x67   : > { %p461_p3 = por %p460_p10, %p459_p4 }
  0x68   : > { %p457_p2 = pneg %p456_p12 }
  0x69   : > { %p463_p7 = por %p462_p6, %p461_p3 }
  0x6b   : > { %p464_p5 = pnand %p463_p7, %p457_p2 }
  0x6d   : > { %467 = shalt.err (!%p464_p5)
}
  0x6e   : > { %333 = dma.vmem_to_hbm [thread:$0]  (%p754_p13), %s692_s14, 128, %s697_s16, %s208_s24  }
  0x6f PF: > { %s233_s30 = sand.u32 1, %s498_s9   ;;  %p755_p8 = scmp.ne.s32.totalorder %s747_s22, 0 }
  0x70   : > { %p756_p9 = scmp.ge.s32.totalorder %s510_s12, 2  ;;  %s234_s3 = scalar_lea.sflag [#allocation4], %s233_s30 }
  0x72   : > { %p343_p0 = pnand %p756_p9, %p755_p8 }
  0x74   : > { %493 = dma.done.wait (!%p343_p0), %s234_s3, 128  }
  0x75   : > { %495 = vsyncadd (!%p343_p0), %s234_s3, 4294967168  ;;  %p18_p1 = scmp.ge.s32.totalorder %s555_s15, 4   ;;  %s757_s9 = smov %s502_s10 }
  0x76   : > { %s758_s10 = smov %s506_s11  ;;  %s759_s11 = smov %s567_s18 }
  0x77   : > { %s760_s12 = smov %s555_s15  ;;  %20 = sbr.rel (!%p18_p1) target bundleno = 7 (0x7), region = 86 }
  0x7e   :  { %239 = vsyncpa [#allocation3], 1 }
  0x7f   :  { %241 = vsyncpa [#allocation3 + $0x1], 1 }
  0x80   :  { %242 = vsyncpa [#allocation6], 1 }
  0x81   :  { %244 = vsyncpa [#allocation6 + $0x1], 1 }
  0x82   :  { %245 = vsyncpa [#allocation4], 1 }
  0x83   :  { %247 = vsyncpa [#allocation4 + $0x1], 1 }

</bundles_post_ra>
